<compile_context>
chip_gen: v7x
topology: tpu7x:2x2x1
jax: 0.10.0
libtpu: 0.0.40
codegen_flags: <defaults>
</compile_context>

<pallas_src>
import jax
import jax.numpy as jnp
from jax import lax
from jax.experimental import pallas as pl
from jax.experimental.pallas import tpu as pltpu

KH = KW = 3  # conv0 kernel size


def fused_conv_kernel(p_ref, w_ref, b_ref, o_ref):
    """Single grid step over the whole batch.

    p_ref : (N, K, M)    f32   im2col patches, K = Cin*KH*KW, M = Ho*Wo
    w_ref : (Cout, K)    f32   fused conv weight (1x1 conv folded into 3x3)
    b_ref : (Cout, 1)    f32   fused bias (b0, b1 and broadcast const folded)
    o_ref : (N, Cout, M) f32   channel-major output (free reshape to NCHW)
    """
    n_batch = p_ref.shape[0]
    w = w_ref[...]
    b = b_ref[...]
    for n in range(n_batch):  # static, tiny batch
        o_ref[n] = jnp.dot(w, p_ref[n], preferred_element_type=jnp.float32) + b


def model_forward(x_nchw, w0_oihw, b0, w1_oi, b1, add_const):
    N, Cin, H, W = x_nchw.shape
    Cout = w1_oi.shape[0]
    Ho, Wo = H - KH + 1, W - KW + 1
    K = Cin * KH * KW
    M = Ho * Wo

    # --- exact algebraic fusion of conv0 (3x3) and conv1 (1x1) -----------------
    w_eff = jnp.einsum('om,mihw->oihw', w1_oi, w0_oihw)   # (Cout, Cin, KH, KW)
    w_mat = w_eff.reshape(Cout, K)                        # row order = (ci, kh, kw)
    b_eff = (w1_oi @ b0 + b1 + add_const).reshape(Cout, 1)

    # --- im2col straight from NCHW (layout plumbing only, no transposes) -------
    taps = []
    for ci in range(Cin):
        for kh in range(KH):
            for kw in range(KW):
                taps.append(
                    x_nchw[:, ci, kh:kh + Ho, kw:kw + Wo].reshape(N, 1, M))
    patches = jnp.concatenate(taps, axis=1)               # (N, K, M)

    out = pl.pallas_call(
        fused_conv_kernel,
        out_shape=jax.ShapeDtypeStruct((N, Cout, M), jnp.float32),
        grid=(1,),
        in_specs=[
            pl.BlockSpec((N, K, M), lambda i: (0, 0, 0)),
            pl.BlockSpec((Cout, K), lambda i: (0, 0)),
            pl.BlockSpec((Cout, 1), lambda i: (0, 0)),
        ],
        out_specs=pl.BlockSpec((N, Cout, M), lambda i: (0, 0, 0)),
        compiler_params=pltpu.CompilerParams(
            dimension_semantics=("arbitrary",)),
    )(patches, w_mat, b_eff)

    return out.reshape(N, Cout, Ho, Wo)                   # free reshape -> NCHW


def reference_forward(x_nchw, w0_oihw, b0, w1_oi, b1, add_const):
    w1_oihw = w1_oi[:, :, None, None]
    y = lax.conv_general_dilated(
        x_nchw, w0_oihw, (1, 1), 'VALID',
        dimension_numbers=('NCHW', 'OIHW', 'NCHW')) + b0[None, :, None, None]
    z = lax.conv_general_dilated(
        y, w1_oihw, (1, 1), 'VALID',
        dimension_numbers=('NCHW', 'OIHW', 'NCHW')) + b1[None, :, None, None]
    return z + add_const[None, :, None, None]


if __name__ == "__main__":
    key = jax.random.PRNGKey(0)
    k_x, k_w0, k_b0, k_w1 = jax.random.split(key, 4)

    # Model parameters (deterministic synthetic init, shapes per the nn.Module):
    #   conv0: Conv2d(4 -> 8, kernel 3)   conv1: Conv2d(8 -> 8, kernel 1), bias = ones(8)
    Cin, Cmid, Cout = 4, 8, 8
    w0 = jax.random.normal(k_w0, (Cmid, Cin, KH, KW), jnp.float32) * 0.1   # OIHW
    b0 = jax.random.normal(k_b0, (Cmid,), jnp.float32) * 0.1
    w1 = jax.random.normal(k_w1, (Cout, Cmid), jnp.float32) * 0.1          # 1x1 conv weight (O,I)
    b1 = jnp.ones((Cout,), jnp.float32)                                    # forced ones bias
    add_const = jnp.array([1.0, 2.0, 3.0, 4.0, 5.0, 5.0, 6.0, 7.0], jnp.float32)

    # Input: NCHW, batch=2, channels=4, spatial=16
    x = jax.random.normal(k_x, (2, 4, 16, 16), jnp.float32)

    fwd = jax.jit(model_forward)
    out = jax.block_until_ready(fwd(x, w0, b0, w1, b1, add_const))

    ref = reference_forward(x, w0, b0, w1, b1, add_const)
    assert out.shape == (2, 8, 14, 14), out.shape
    assert jnp.allclose(out, ref, atol=1e-4, rtol=1e-4), "mismatch vs reference"

    print("KERNEL_OK")
</pallas_src>

<mosaic_0001>
module attributes {stable_mosaic.version = 11 : i64} {
  func.func @fused_conv_kernel(%arg0: i32, %arg1: memref<2x36x196xf32, #tpu.memory_space<vmem>>, %arg2: memref<8x36xf32, #tpu.memory_space<vmem>>, %arg3: memref<8x1xf32, #tpu.memory_space<vmem>>, %arg4: memref<2x8x196xf32, #tpu.memory_space<vmem>>) attributes {dimension_semantics = [#tpu.dimension_semantics<arbitrary>], iteration_bounds = array<i64: 1>, scalar_prefetch = 0 : i64, scratch_operands = 0 : i64, tpu.core_type = #tpu.core_type<tc>, window_params = [{pipeline_mode = #tpu.pipeline_mode<synchronous>, transform_indices = @transform_0, window_bounds = array<i64: 2, 36, 196>}, {pipeline_mode = #tpu.pipeline_mode<synchronous>, transform_indices = @transform_1, window_bounds = array<i64: 8, 36>}, {pipeline_mode = #tpu.pipeline_mode<synchronous>, transform_indices = @transform_2, window_bounds = array<i64: 8, 1>}, {pipeline_mode = #tpu.pipeline_mode<synchronous>, transform_indices = @transform_3, window_bounds = array<i64: 2, 8, 196>}]} {
    %c0 = arith.constant 0 : index
    %c0_0 = arith.constant 0 : index
    %0 = vector.load %arg2[%c0, %c0_0] : memref<8x36xf32, #tpu.memory_space<vmem>>, vector<8x36xf32>
    %c0_1 = arith.constant 0 : index
    %c0_2 = arith.constant 0 : index
    %1 = vector.load %arg3[%c0_1, %c0_2] : memref<8x1xf32, #tpu.memory_space<vmem>>, vector<8x1xf32>
    %c0_3 = arith.constant 0 : index
    %c0_4 = arith.constant 0 : index
    %c0_5 = arith.constant 0 : index
    %2 = vector.load %arg1[%c0_3, %c0_4, %c0_5] : memref<2x36x196xf32, #tpu.memory_space<vmem>>, vector<1x36x196xf32>
    %3 = vector.shape_cast %2 : vector<1x36x196xf32> to vector<36x196xf32>
    %cst = arith.constant dense<0.000000e+00> : vector<8x196xf32>
    %4 = tpu.matmul %0, %3, %cst {dimension_numbers = #tpu.dot_dimension_numbers<[1], [0], [0], [1], [0, 0, 1, 1], [], []>} : vector<8x36xf32>, vector<36x196xf32>, vector<8x196xf32> -> vector<8x196xf32>
    %5 = vector.broadcast %1 : vector<8x1xf32> to vector<8x196xf32>
    %6 = arith.addf %4, %5 : vector<8x196xf32>
    %c0_6 = arith.constant 0 : index
    %c0_7 = arith.constant 0 : index
    %c0_8 = arith.constant 0 : index
    %7 = vector.load %arg4[%c0_6, %c0_7, %c0_8] : memref<2x8x196xf32, #tpu.memory_space<vmem>>, vector<1x8x196xf32>
    %8 = vector.shape_cast %7 : vector<1x8x196xf32> to vector<8x196xf32>
    %9 = vector.shape_cast %6 : vector<8x196xf32> to vector<1x8x196xf32>
    tpu.vector_store %arg4[%c0_6, %c0_7, %c0_8], %9 {strides = array<i32>} : memref<2x8x196xf32, #tpu.memory_space<vmem>>, vector<1x8x196xf32>,
    %c1 = arith.constant 1 : index
    %c0_9 = arith.constant 0 : index
    %c0_10 = arith.constant 0 : index
    %10 = vector.load %arg1[%c1, %c0_9, %c0_10] : memref<2x36x196xf32, #tpu.memory_space<vmem>>, vector<1x36x196xf32>
    %11 = vector.shape_cast %10 : vector<1x36x196xf32> to vector<36x196xf32>
    %cst_11 = arith.constant dense<0.000000e+00> : vector<8x196xf32>
    %12 = tpu.matmul %0, %11, %cst_11 {dimension_numbers = #tpu.dot_dimension_numbers<[1], [0], [0], [1], [0, 0, 1, 1], [], []>} : vector<8x36xf32>, vector<36x196xf32>, vector<8x196xf32> -> vector<8x196xf32>
    %13 = vector.broadcast %1 : vector<8x1xf32> to vector<8x196xf32>
    %14 = arith.addf %12, %13 : vector<8x196xf32>
    %c1_12 = arith.constant 1 : index
    %c0_13 = arith.constant 0 : index
    %c0_14 = arith.constant 0 : index
    %15 = vector.load %arg4[%c1_12, %c0_13, %c0_14] : memref<2x8x196xf32, #tpu.memory_space<vmem>>, vector<1x8x196xf32>
    %16 = vector.shape_cast %15 : vector<1x8x196xf32> to vector<8x196xf32>
    %17 = vector.shape_cast %14 : vector<8x196xf32> to vector<1x8x196xf32>
    tpu.vector_store %arg4[%c1_12, %c0_13, %c0_14], %17 {strides = array<i32>} : memref<2x8x196xf32, #tpu.memory_space<vmem>>, vector<1x8x196xf32>,
    return
  }
  func.func @transform_0(%arg0: i32) -> (i32, i32, i32) {
    %c0_i32 = arith.constant 0 : i32
    %c0_i32_0 = arith.constant 0 : i32
    %c0_i32_1 = arith.constant 0 : i32
    %c0_i32_2 = arith.constant 0 : i32
    return %c0_i32, %c0_i32_0, %c0_i32_1 : i32, i32, i32
  }
  func.func @transform_1(%arg0: i32) -> (i32, i32) {
    %c0_i32 = arith.constant 0 : i32
    %c0_i32_0 = arith.constant 0 : i32
    %c0_i32_1 = arith.constant 0 : i32
    return %c0_i32, %c0_i32_0 : i32, i32
  }
  func.func @transform_2(%arg0: i32) -> (i32, i32) {
    %c0_i32 = arith.constant 0 : i32
    %c0_i32_0 = arith.constant 0 : i32
    %c0_i32_1 = arith.constant 0 : i32
    return %c0_i32, %c0_i32_0 : i32, i32
  }
  func.func @transform_3(%arg0: i32) -> (i32, i32, i32) {
    %c0_i32 = arith.constant 0 : i32
    %c0_i32_0 = arith.constant 0 : i32
    %c0_i32_1 = arith.constant 0 : i32
    %c0_i32_2 = arith.constant 0 : i32
    return %c0_i32, %c0_i32_0, %c0_i32_1 : i32, i32, i32
  }
}

</mosaic_0001>

<bundles_post_ra>
// kernel: squeeze.53
= control target key start
LH: loop header
LB: loop body
LE: loop exit
PB: predicated region body
PF: predicated region fallthrough
CT: control target
= control target key end

     0   :  { %s7_s6 = smov 3  ;;  %s10_s7 = smov 3  ;;  %vm12_vm0 = vcmask 15360   ;;  %vm4_vm1 = vcmask 113664   ;;  %vm16_vm2 = vcmask 97280   ;;  %vm19_vm3 = vcmask 1048560   ;;  %s244_s0 = inlined_call_operand.vmem [shape: f32[2,1,14,14], index: 0, kind: input, shape index: {}]   ;;  %s245_s1 = inlined_call_operand.vmem [shape: f32[2,1,196], index: 1, kind: output, shape index: {}]  }
   0x1   :  { %v134_v0 = vld [vmem:[%s244_s0 + $0x9] ss:$16 sm:%s7_s6]   ;;  %s29_s12 = smov 3  ;;  %s22_s15 = smov 3  ;;  %vm26_vm4 = vcmask 1032064   ;;  %vm33_vm5 = vcmask 917264  }
   0x2   :  { %v135_v1 = vld [vmem:[%s244_s0 + $0x9] ss:$16 sm:%s10_s7]   ;;  %v137_v3 = vld [vmem:[%s244_s0 + $0x7] ss:$16 sm:%s29_s12]   ;;  %s164_s16 = smov 126   ;;  %s165_s17 = smov 98  }
   0x3   :  { %v13_v2 = vsel %vm12_vm0, %v135_v1, %v134_v0  ;;  %31 = vrot.lane.b32.xlu1 %v137_v3, %s165_s17  ;;  %s36_s18 = smov 3  ;;  %v136_v4 = vld [vmem:[%s244_s0 + $0x8] ss:$16 sm:%s22_s15]   ;;  %s43_s23 = smov 3  ;;  %vm40_vm6 = vcmask 802464   ;;  %vm47_vm7 = vcmask 687664  }
   0x4   :  { %14 = vrot.lane.b32.xlu0 %v13_v2, %s164_s16  ;;  %v138_v5 = vld [vmem:[%s244_s0 + $0x6] ss:$16 sm:%s36_s18]   ;;  %s50_s24 = smov 3  ;;  %s166_s25 = smov 112   ;;  %vm54_vm8 = vcmask 572864   ;;  %vm61_vm9 = vcmask 556464  }
   0x5   :  { %s167_s26 = smov 84   ;;  %v139_v6 = vld [vmem:[%s244_s0 + $0x5] ss:$16 sm:%s43_s23]   ;;  %v140_v7 = vld [vmem:[%s244_s0 + $0x4] ss:$16 sm:%s50_s24]   ;;  %s57_s2 = smov 3 }
   0x6   :  { %s65_s3 = smov 3  ;;  %s168_s4 = smov 70   ;;  %v141_v8 = vld [vmem:[%s244_s0 + $0xd] ss:$16 sm:%s57_s2]   ;;  %vm69_vm10 = vcmask 458064   ;;  %vm76_vm11 = vcmask 441664  }
   0x7   :  { %38 = vrot.lane.b32.xlu1 %v138_v5, %s167_s26  ;;  %s169_s5 = smov 56   ;;  %v142_v9 = vld [vmem:[%s244_s0 + $0x3] ss:$16 sm:%s65_s3]   ;;  %s72_s10 = smov 3  ;;  %vm84_vm12 = vcmask 343264   ;;  %vm91_vm13 = vcmask 326864  }
   0x8   :  { %24 = vrot.lane.b32.xlu0 %v136_v4, %s166_s25  ;;  %s80_s11 = smov 3  ;;  %s2_s12 = smov 3  ;;  %v143_v11 = vld [vmem:[%s244_s0 + $0xc] ss:$16 sm:%s72_s10]   ;;  %vm99_vm14 = vcmask 228464   ;;  %vm106_vm15 = vcmask 212064  }
   0x9   :  { %v3_v10 = vld [vmem:[%s244_s0] ss:$16 sm:%s2_s12]   ;;  %s170_s15 = smov 54   ;;  %s171_s16 = smov 42   ;;  %v144_v12 = vld [vmem:[%s244_s0 + $0x2] ss:$16 sm:%s80_s11]  }
   0xa   :  { %5 = vst.msk [vmem:[#allocation0] ss:$16 sm:$0x3] %vm4_vm1, %v3_v10   ;;  %s87_s21 = smov 3  ;;  %s95_s22 = smov 3 }
   0xb   :  { %52 = vrot.lane.b32.xlu1 %v140_v7, %s169_s5  ;;  %s172_s23 = smov 40   ;;  %s173_s24 = smov 28   ;;  %v145_v13 = vld [vmem:[%s244_s0 + $0xb] ss:$16 sm:%s87_s21]  }
   0xc   :  { %45 = vrot.lane.b32.xlu0 %v139_v6, %s168_s4  ;;  %v146_v14 = vld [vmem:[%s244_s0 + $0x1] ss:$16 sm:%s95_s22]   ;;  %s102_s29 = smov 3  ;;  %s174_s30 = smov 26  }
   0xd   :  { %s175_s2 = smov 14   ;;  %v147_v15 = vld [vmem:[%s244_s0 + $0xa] ss:$16 sm:%s102_s29]   ;;  %s176_s0 = smov 12  }
   0xf   :  { %67 = vrot.lane.b32.xlu1 %v142_v9, %s171_s16 }
  0x10   :  { %59 = vrot.lane.b32.xlu0 %v141_v8, %s170_s15 }
  0x13   :  { %82 = vrot.lane.b32.xlu1 %v144_v12, %s173_s24 }
  0x14   :  { %74 = vrot.lane.b32.xlu0 %v143_v11, %s172_s23 }
  0x17   :  { %97 = vrot.lane.b32.xlu1 %v146_v14, %s175_s2 }
  0x18   :  { %89 = vrot.lane.b32.xlu0 %v145_v13, %s174_s30 }
  0x1c   :  { %104 = vrot.lane.b32.xlu0 %v147_v15, %s176_s0 }
  0x75   :  { %v32_v17 = vpop.permute.xlu1 %31  }
  0x76   :  { %v15_v16 = vpop.permute.xlu0 %14  }
  0x77   :  { %18 = vst.msk [vmem:[#allocation0 + $0x8] ss:$16 sm:$0x3] %vm16_vm2, %v15_v16  }
  0x78   :  { %20 = vst.msk [vmem:[#allocation0] ss:$16 sm:$0x3] %vm19_vm3, %v15_v16  }
  0x79   :  { %v39_v19 = vpop.permute.xlu1 %38  }
  0x7a   :  { %v25_v18 = vpop.permute.xlu0 %24  }
  0x7b   :  { %27 = vst.msk [vmem:[#allocation0] ss:$16 sm:$0x3] %vm26_vm4, %v25_v18  }
  0x7c   :  { %34 = vst.msk [vmem:[#allocation0] ss:$16 sm:$0x3] %vm33_vm5, %v32_v17  }
  0x7d   :  { %41 = vst.msk [vmem:[#allocation0] ss:$16 sm:$0x3] %vm40_vm6, %v39_v19   ;;  %v53_v21 = vpop.permute.xlu1 %52  }
  0x7e   :  { %v46_v20 = vpop.permute.xlu0 %45  }
  0x7f   :  { %48 = vst.msk [vmem:[#allocation0] ss:$16 sm:$0x3] %vm47_vm7, %v46_v20  }
  0x80   :  { %55 = vst.msk [vmem:[#allocation0] ss:$16 sm:$0x3] %vm54_vm8, %v53_v21  }
  0x81   :  { %v68_v23 = vpop.permute.xlu1 %67  }
  0x82   :  { %v60_v22 = vpop.permute.xlu0 %59   ;;  %70 = vst.msk [vmem:[#allocation0] ss:$16 sm:$0x3] %vm69_vm10, %v68_v23  }
  0x83   :  { %63 = vst.msk [vmem:[#allocation0 + $0x8] ss:$16 sm:$0x3] %vm61_vm9, %v60_v22  }
  0x85   :  { %v83_v25 = vpop.permute.xlu1 %82  }
  0x86   :  { %v75_v24 = vpop.permute.xlu0 %74   ;;  %85 = vst.msk [vmem:[#allocation0] ss:$16 sm:$0x3] %vm84_vm12, %v83_v25  }
  0x87   :  { %78 = vst.msk [vmem:[#allocation0 + $0x8] ss:$16 sm:$0x3] %vm76_vm11, %v75_v24  }
  0x89   :  { %v98_v27 = vpop.permute.xlu1 %97  }
  0x8a   :  { %v90_v26 = vpop.permute.xlu0 %89   ;;  %100 = vst.msk [vmem:[#allocation0] ss:$16 sm:$0x3] %vm99_vm14, %v98_v27  }
  0x8b   :  { %93 = vst.msk [vmem:[#allocation0 + $0x8] ss:$16 sm:$0x3] %vm91_vm13, %v90_v26  }
  0x8e   :  { %v105_v28 = vpop.permute.xlu0 %104  }
  0x8f   :  { %108 = vst.msk [vmem:[#allocation0 + $0x8] ss:$16 sm:$0x3] %vm106_vm15, %v105_v28  }
  0x91   :  { %v112_v29 = vld [vmem:[#allocation0] sm:$0x1]  ;;  %v121_v30 = vld [vmem:[#allocation0 + $0x10] sm:$0x1] }
  0x92   :  { %114 = vst [vmem:[%s245_s1] sm:$0x1] %v112_v29  ;;  %149 = vst [vmem:[%s245_s1 + $0x2] sm:$0x1] %v121_v30 }
  0x96   :  { %v116_v31 = vld [vmem:[#allocation0 + $0x8] sm:$0x1]  ;;  %v127_v32 = vld [vmem:[#allocation0 + $0x18] sm:$0x1] }
  0x97   :  { %148 = vst [vmem:[%s245_s1 + $0x1] sm:$0x1] %v116_v31  ;;  %150 = vst [vmem:[%s245_s1 + $0x3] sm:$0x1] %v127_v32 }

// kernel: model_forward.1
= control target key start
LH: loop header
LB: loop body
LE: loop exit
PB: predicated region body
PF: predicated region fallthrough
CT: control target
= control target key end

     0   :  { %v248_v3 = vmov 0.0   ;;  %v249_v8 = vmov 0   ;;  %vm35_vm0 = vcmask 1043456   ;;  %vm31_vm1 = vcmask 293888   ;;  %s348_s0 = inlined_call_operand.vmem [shape: f32[2,36,196], index: 0, kind: input, shape index: {}]   ;;  %s349_s2 = inlined_call_operand.vmem [shape: f32[8,1], index: 2, kind: input, shape index: {}]   ;;  %s350_s1 = inlined_call_operand.vmem [shape: f32[8,36], index: 1, kind: input, shape index: {}]   ;;  %s351_s3 = inlined_call_operand.vmem [shape: f32[2,8,196], index: 3, kind: output, shape index: {}]  }
   0x1   :  { %v17_v0 = vld [vmem:[%s348_s0 + $0x8] sm:$0xff]  ;;  %v19_v1 = vld [vmem:[%s348_s0 + $0x18] sm:$0xff]  ;;  %106 = vmatprep.mubr.f32.mxu0 %v248_v3  ;;  %197 = vmatprep.mubr.f32.mxu1 %v248_v3  ;;  %v16_v6 = vld [vmem:[%s348_s0] sm:$0xff]  ;;  %vm114_vm2 = vcmask 556032  }
   0x2   :  { %v215_v2 = vld [vmem:[%s348_s0 + $0x58] sm:$0xff]  ;;  %v229_v4 = vpack.c.bf16 %v19_v1, %v17_v0  ;;  %v217_v5 = vld [vmem:[%s348_s0 + $0x68] sm:$0xff]  ;;  %v18_v7 = vld [vmem:[%s348_s0 + $0x10] sm:$0xff]  ;;  %247 = vset.pattern.permute.xlu0 %v249_v8 }
   0x3   :  { %v237_v9 = vpack.c.bf16 %v217_v5, %v215_v2  ;;  %v231_v10 = vpack.c.bf16 %v18_v7, %v16_v6  ;;  %v214_v11 = vld [vmem:[%s348_s0 + $0x50] sm:$0xff]  ;;  %v216_v12 = vld [vmem:[%s348_s0 + $0x60] sm:$0xff]  ;;  %v21_v13 = vld [vmem:[%s348_s0 + $0x28] sm:$0xff] }
   0x4   :  { %230 = vmatprep.subr.bf16.mxu0 %v229_v4  ;;  %v239_v14 = vpack.c.bf16 %v216_v12, %v214_v11  ;;  %v23_v15 = vld [vmem:[%s348_s0 + $0x38] sm:$0xff]  ;;  %v221_v17 = vld [vmem:[%s348_s0 + $0x88] sm:$0xff]  ;;  %v20_v20 = vld [vmem:[%s348_s0 + $0x20] sm:$0xff] }
   0x5   :  { %v219_v16 = vld [vmem:[%s348_s0 + $0x78] sm:$0xff]  ;;  %238 = vmatprep.subr.bf16.mxu1 %v237_v9  ;;  %232 = vmatpush1.bf16.msra.mxu0 %v231_v10  ;;  %v233_v18 = vpack.c.bf16 %v23_v15, %v21_v13  ;;  %v22_v21 = vld [vmem:[%s348_s0 + $0x30] sm:$0xff]  ;;  %v220_v24 = vld [vmem:[%s348_s0 + $0x80] sm:$0xff] }
   0x6   :  { %v241_v19 = vpack.c.bf16 %v221_v17, %v219_v16  ;;  %v218_v22 = vld [vmem:[%s348_s0 + $0x70] sm:$0xff]  ;;  %240 = vmatpush1.bf16.msra.mxu1 %v239_v14  ;;  %v235_v23 = vpack.c.bf16 %v22_v21, %v20_v20  ;;  %v25_v26 = vld [vmem:[%s348_s0 + $0x48] sm:$0xf]  ;;  %v223_v27 = vld [vmem:[%s348_s0 + $0x98] sm:$0xf] }
   0x7   :  { %234 = vmatprep.subr.bf16.mxu0 %v233_v18  ;;  %v243_v25 = vpack.c.bf16 %v220_v24, %v218_v22  ;;  %v15_v28 = vld [vmem:[%s349_s2] sm:$0xff]  ;;  %v222_v30 = vld [vmem:[%s348_s0 + $0x90] sm:$0xf] }
   0x8   :  { %242 = vmatprep.subr.bf16.mxu1 %v241_v19  ;;  %28 = vperm.xlu0 %247, %v15_v28   ;;  %v24_v29 = vld [vmem:[%s348_s0 + $0x40] sm:$0xf] }
   0x9   :  { %236 = vmatpush1.bf16.msra.mxu0 %v235_v23  ;;  %v14_v31 = vld [vmem:[%s350_s1] sm:$0xff] }
   0xa   :  { %244 = vmatpush1.bf16.msra.mxu1 %v243_v25  ;;  %211 = vmatprep.subr.msk.mxu0 %vm35_vm0, %v25_v26 }
   0xb   :  { %224 = vmatprep.subr.msk.mxu1 %vm35_vm0, %v223_v27 }
   0xd   :  { %212 = vmatpush1.msk.msra.mxu0 %vm35_vm0, %v24_v29 }
   0xe   :  { %225 = vmatpush1.msk.msra.mxu1 %vm35_vm0, %v222_v30  ;;  %213 = vmatmul.mubr.msk.f32.vlgmr.msra.gmra.mrb[0].mxu0 %vm31_vm1, %v14_v31 }
   0xf   :  { %226 = vmatmul.mubr.msk.f32.vlgmr.msra.gmra.mrb[0].mxu1 %vm31_vm1, %v14_v31 }
  0x87   :  { %v29_v32 = vpop.permute.xlu0 %28 }
  0xe1   :  { %v108_v33 = vpop.f32.mrb[0].mxu0 }
  0xe2   :  { %v109_v34 = vadd.f32 %v108_v33, %v29_v32  ;;  %v199_v35 = vpop.f32.mrb[0].mxu1  ;;  %v110_v36 = vpop.f32.mrb[1].mxu0 }
  0xe3   :  { %v200_v37 = vadd.f32 %v199_v35, %v29_v32  ;;  %v111_v38 = vadd.f32 %v110_v36, %v29_v32  ;;  %v201_v39 = vpop.f32.mrb[1].mxu1 }
  0xe4   :  { %113 = vst [vmem:[%s351_s3] sm:$0xff] %v109_v34  ;;  %v202_v40 = vadd.f32 %v201_v39, %v29_v32 }
  0xe5   :  { %227 = vst [vmem:[%s351_s3 + $0x10] sm:$0xff] %v200_v37  ;;  %115 = vst.msk [vmem:[%s351_s3 + $0x8] sm:$0xff] %vm114_vm2, %v111_v38 }
  0xe6   :  { %228 = vst.msk [vmem:[%s351_s3 + $0x18] sm:$0xff] %vm114_vm2, %v202_v40 }

</bundles_post_ra>
